<compile_context>
chip_gen: v6e
topology: v6e:2x2x1
jax: 0.10.0
libtpu: 0.0.40
codegen_flags: <defaults>
</compile_context>

<pallas_src>
import numpy as np
import jax
import jax.numpy as jnp
from jax.experimental import pallas as pl
from jax.experimental.pallas import tpu as pltpu


# ---------------------------------------------------------------------------
# Interpolation weight matrices (PyTorch bilinear, align_corners=False).
# ---------------------------------------------------------------------------
def _bilinear_weight_matrix(in_size: int, out_size: int) -> np.ndarray:
    """Dense (out_size, in_size) matrix matching PyTorch bilinear interpolate
    with align_corners=False (antialias=False)."""
    scale = in_size / out_size
    out_idx = np.arange(out_size)
    src = (out_idx + 0.5) * scale - 0.5
    src = np.maximum(src, 0.0)                      # PyTorch clamps negative coords to 0
    i0 = np.floor(src).astype(np.int64)
    i0 = np.minimum(i0, in_size - 1)
    i1 = np.minimum(i0 + 1, in_size - 1)
    lam1 = (src - i0).astype(np.float32)
    lam0 = (1.0 - lam1).astype(np.float32)
    W = np.zeros((out_size, in_size), dtype=np.float32)
    W[out_idx, i0] += lam0
    W[out_idx, i1] += lam1
    return W


# ---------------------------------------------------------------------------
# Generation-aware budgets and tile selection.
# ---------------------------------------------------------------------------
def _round_up(a: int, m: int) -> int:
    return -(-a // m) * m


def _round_down(a: int, m: int) -> int:
    return (a // m) * m


def _tpu_budget():
    """Return (per-step live-data target bytes, vmem_limit_bytes, min grid steps)."""
    kind = ""
    try:
        kind = jax.devices()[0].device_kind.lower()
    except Exception:
        pass
    if ("v5" in kind) or ("v6" in kind):
        # 128 MiB VMEM, single TensorCore: big slabs, no multi-step requirement.
        return 8 << 20, 48 << 20, 1
    # v7x (64 MiB / TC, 2 TCs) or unknown: be conservative, keep >=4 steps so both
    # cores have >=2 steps each and DMA/compute overlap is preserved.
    return (7 << 20) // 2, 32 << 20, 4


def _pick_lane_tile(nc, bytes_per_col, budget, min_steps):
    """Tile size along the lane (N*C) axis for the Kronecker path.
    Tile is either the full axis or a multiple of 128 (lane quantum)."""
    cap = max(128, _round_down(int(budget // max(bytes_per_col, 1)), 128))
    want = cap
    if min_steps > 1 and nc > 128 * min_steps:
        want = min(want, max(128, _round_down(-(-nc // min_steps), 128)))
    if want >= nc:
        return nc, 1, 0
    tile = want
    steps = -(-nc // tile)
    # v7x: prefer an even step count so both TensorCores get equal work.
    if min_steps >= 4 and steps % 2 == 1:
        alt = max(128, _round_up(-(-nc // (steps + 1)), 128))
        if alt < nc and (-(-nc // alt)) % 2 == 0:
            tile, steps = alt, -(-nc // alt)
    return tile, steps, steps * tile - nc


def _pick_batch_tile(nc, bytes_per_img, budget, min_steps):
    """Image-slab size along the flattened (N*C) axis for the two-pass path."""
    cap = max(1, int(budget // max(bytes_per_img, 1)))
    want = cap
    if min_steps > 1 and nc > min_steps:
        want = min(want, -(-nc // min_steps))
    B = max(1, min(want, nc))
    steps = -(-nc // B)
    if min_steps >= 4 and steps > 1 and steps % 2 == 1:
        alt = max(1, -(-nc // (steps + 1)))
        if (-(-nc // alt)) % 2 == 0:
            B, steps = alt, -(-nc // alt)
    return B, steps, steps * B - nc


# ---------------------------------------------------------------------------
# Kernels.
# ---------------------------------------------------------------------------
def _kron_resize_kernel(k_ref, x_ref, o_ref):
    # k_ref: (H_out*W_out, H_in*W_in) Kronecker interpolation matrix (compute dtype)
    # x_ref: (H_in*W_in, T)           channels-last slab of T = NC-tile columns
    # o_ref: (H_out*W_out, T)         lane-dense output slab
    x = x_ref[...].astype(k_ref.dtype)
    o = jnp.dot(k_ref[...], x, preferred_element_type=jnp.float32)
    o_ref[...] = o.astype(o_ref.dtype)


def _twopass_resize_kernel(wwt_ref, wht_ref, x_ref, o_ref):
    # wwt_ref: (W_in, W_out)  transposed width-interp matrix (compute dtype)
    # wht_ref: (H_in, H_out)  transposed height-interp matrix (compute dtype)
    # x_ref  : (B, H_in, W_in)   slab of B channel-images
    # o_ref  : (B, H_out, W_out)
    B, H_in, W_in = x_ref.shape
    _, H_out, W_out = o_ref.shape
    cdt = wwt_ref.dtype

    # Width pass: fold batch into M -> (B*H_in, W_in) @ (W_in, W_out)
    x2 = x_ref[...].astype(cdt).reshape(B * H_in, W_in)
    t = jnp.dot(x2, wwt_ref[...], preferred_element_type=jnp.float32)   # (B*H_in, W_out) f32

    # Cast to compute dtype BEFORE the transpose (halves XLU / relayout traffic
    # when cdt is 16-bit; numerically identical since the cast happens anyway).
    t = t.astype(cdt).reshape(B, H_in, W_out)
    t = jnp.swapaxes(t, 1, 2).reshape(B * W_out, H_in)                  # (B*W_out, H_in)

    # Height pass: (B*W_out, H_in) @ (H_in, H_out)
    o = jnp.dot(t, wht_ref[...], preferred_element_type=jnp.float32)    # (B*W_out, H_out) f32

    # Cast to the (possibly 16-bit) output dtype BEFORE the final transpose.
    o = o.astype(o_ref.dtype).reshape(B, W_out, H_out)
    o_ref[...] = jnp.swapaxes(o, 1, 2)                                   # (B, H_out, W_out)


# ---------------------------------------------------------------------------
# Wrappers.
# ---------------------------------------------------------------------------
def _downsample_kron(x, trg_size, Wh, Ww, compute_dtype, slab_target, vmem_limit, min_steps):
    N, C, H_in, W_in = x.shape
    H_out, W_out = trg_size
    nc = N * C
    hw_in = H_in * W_in
    hw_out = H_out * W_out

    kron = jnp.asarray(np.kron(Wh, Ww), dtype=compute_dtype)      # (hw_out, hw_in)

    # Channels-last layout: (hw_in, N*C).  Wrapper-side layout plumbing only.
    x_cl = jnp.transpose(x.reshape(nc, hw_in))                    # (hw_in, nc)

    in_isz = np.dtype(x.dtype).itemsize
    cdt_isz = np.dtype(compute_dtype).itemsize
    cast_extra = cdt_isz if np.dtype(compute_dtype) != np.dtype(x.dtype) else 0
    # Per NC-column live VMEM: double-buffered in/out blocks + cast copy + f32 acc.
    bytes_per_col = hw_in * (2 * in_isz + cast_extra) + hw_out * (2 * in_isz + 4)
    fixed = 2 * hw_out * hw_in * cdt_isz                          # constant weight block
    budget = max(slab_target - fixed, 128 * bytes_per_col)

    tile, steps, pad = _pick_lane_tile(nc, bytes_per_col, budget, min_steps)
    if pad:
        x_cl = jnp.pad(x_cl, ((0, 0), (0, pad)))

    out_cl = pl.pallas_call(
        _kron_resize_kernel,
        out_shape=jax.ShapeDtypeStruct((hw_out, nc + pad), x.dtype),
        grid_spec=pltpu.PrefetchScalarGridSpec(
            num_scalar_prefetch=0,
            grid=(steps,),
            in_specs=[
                pl.BlockSpec((hw_out, hw_in), lambda i: (0, 0)),  # kron weights (constant)
                pl.BlockSpec((hw_in, tile), lambda i: (0, i)),    # channels-last input slab
            ],
            out_specs=pl.BlockSpec((hw_out, tile), lambda i: (0, i)),
        ),
        compiler_params=pltpu.CompilerParams(
            dimension_semantics=("parallel",),
            vmem_limit_bytes=vmem_limit,
        ),
    )(kron, x_cl)

    return jnp.transpose(out_cl[:, :nc]).reshape(N, C, H_out, W_out)


def _downsample_two_pass(x, trg_size, Wh, Ww, compute_dtype, slab_target, vmem_limit, min_steps):
    N, C, H_in, W_in = x.shape
    H_out, W_out = trg_size
    nc = N * C

    wwt = jnp.asarray(Ww.T, dtype=compute_dtype)                  # (W_in, W_out)
    wht = jnp.asarray(Wh.T, dtype=compute_dtype)                  # (H_in, H_out)

    in_isz = np.dtype(x.dtype).itemsize
    cdt_isz = np.dtype(compute_dtype).itemsize
    # Per-image live VMEM: double-buffered in/out blocks, compute-dtype copy,
    # f32 width-pass intermediate + its compute-dtype transpose copy, f32 result.
    bytes_per_img = (
        H_in * W_in * (2 * in_isz + cdt_isz)
        + H_in * W_out * (4 + cdt_isz)
        + W_out * H_out * (4 + in_isz)
        + H_out * W_out * (2 * in_isz)
    )
    fixed = 2 * (W_in * W_out + H_in * H_out) * cdt_isz
    budget = max(slab_target - fixed, bytes_per_img)

    B, steps, pad = _pick_batch_tile(nc, bytes_per_img, budget, min_steps)

    x_flat = x.reshape(nc, H_in, W_in)
    if pad:
        x_flat = jnp.pad(x_flat, ((0, pad), (0, 0), (0, 0)))

    out_flat = pl.pallas_call(
        _twopass_resize_kernel,
        out_shape=jax.ShapeDtypeStruct((nc + pad, H_out, W_out), x.dtype),
        grid_spec=pltpu.PrefetchScalarGridSpec(
            num_scalar_prefetch=0,
            grid=(steps,),
            in_specs=[
                pl.BlockSpec((W_in, W_out), lambda i: (0, 0)),        # wwt (constant)
                pl.BlockSpec((H_in, H_out), lambda i: (0, 0)),        # wht (constant)
                pl.BlockSpec((B, H_in, W_in), lambda i: (i, 0, 0)),   # image slab
            ],
            out_specs=pl.BlockSpec((B, H_out, W_out), lambda i: (i, 0, 0)),
        ),
        compiler_params=pltpu.CompilerParams(
            dimension_semantics=("parallel",),
            vmem_limit_bytes=vmem_limit,
        ),
    )(wwt, wht, x_flat)

    return out_flat[:nc].reshape(N, C, H_out, W_out)


def downsample_to_size(x: jax.Array, trg_size, trg_mode: str = "bilinear",
                       compute_dtype=jnp.float32) -> jax.Array:
    """Pallas equivalent of F.interpolate(x, trg_size, mode='bilinear',
    align_corners=False). x is NCHW."""
    assert trg_mode == "bilinear"
    N, C, H_in, W_in = x.shape
    H_out, W_out = trg_size

    slab_target, vmem_limit, min_steps = _tpu_budget()

    Wh = _bilinear_weight_matrix(H_in, H_out)                     # (H_out, H_in)
    Ww = _bilinear_weight_matrix(W_in, W_out)                     # (W_out, W_in)

    cdt_isz = np.dtype(compute_dtype).itemsize
    kron_bytes = H_out * W_out * H_in * W_in * cdt_isz
    use_kron = (H_in * W_in <= 2048) and (H_out * W_out <= 2048) and (kron_bytes <= (4 << 20))

    if use_kron:
        return _downsample_kron(x, trg_size, Wh, Ww, compute_dtype,
                                slab_target, vmem_limit, min_steps)
    return _downsample_two_pass(x, trg_size, Wh, Ww, compute_dtype,
                                slab_target, vmem_limit, min_steps)


# ---------------------------------------------------------------------------
# Reference + tests.
# ---------------------------------------------------------------------------
def _reference_bilinear(x: np.ndarray, trg_size) -> np.ndarray:
    """Per-pixel f32 numpy reference of PyTorch bilinear (align_corners=False)."""
    N, C, H_in, W_in = x.shape
    H_out, W_out = trg_size
    Wh = _bilinear_weight_matrix(H_in, H_out)
    Ww = _bilinear_weight_matrix(W_in, W_out)
    return np.einsum("oh,nchw,pw->ncop", Wh, x.astype(np.float32), Ww).astype(np.float32)


if __name__ == "__main__":
    key = jax.random.PRNGKey(0)

    # Test 1: small NCHW downsample (Kronecker / channels-last path).
    N, C, H, W = 2, 4, 16, 16
    trg_size = (8, 8)
    x = jax.random.normal(key, (N, C, H, W), dtype=jnp.float32)
    out = jax.block_until_ready(downsample_to_size(x, trg_size, "bilinear"))
    assert out.shape == (N, C, trg_size[0], trg_size[1]), out.shape
    ref = _reference_bilinear(np.asarray(x), trg_size)
    np.testing.assert_allclose(np.asarray(out, dtype=np.float32), ref, rtol=1e-2, atol=1e-2)

    # Test 2: non-power-of-two channel count (Kronecker path, odd N*C).
    x2 = jax.random.normal(jax.random.PRNGKey(1), (2, 3, 16, 16), dtype=jnp.float32)
    out2 = jax.block_until_ready(downsample_to_size(x2, (8, 8), "bilinear"))
    assert out2.shape == (2, 3, 8, 8), out2.shape
    ref2 = _reference_bilinear(np.asarray(x2), (8, 8))
    np.testing.assert_allclose(np.asarray(out2, dtype=np.float32), ref2, rtol=1e-2, atol=1e-2)

    # Test 3: larger spatial size -> exercises the two-pass (separable) path.
    x3 = jax.random.normal(jax.random.PRNGKey(2), (2, 3, 64, 64), dtype=jnp.float32)
    out3 = jax.block_until_ready(downsample_to_size(x3, (32, 32), "bilinear"))
    assert out3.shape == (2, 3, 32, 32), out3.shape
    ref3 = _reference_bilinear(np.asarray(x3), (32, 32))
    np.testing.assert_allclose(np.asarray(out3, dtype=np.float32), ref3, rtol=1e-2, atol=1e-2)

    print("KERNEL_OK")
</pallas_src>

<mosaic_0001>
module attributes {stable_mosaic.version = 11 : i64} {
  func.func @_kron_resize_kernel(%arg0: i32, %arg1: memref<64x256xf32, #tpu.memory_space<vmem>>, %arg2: memref<256x8xf32, #tpu.memory_space<vmem>>, %arg3: memref<64x8xf32, #tpu.memory_space<vmem>>) attributes {dimension_semantics = [#tpu.dimension_semantics<parallel>], iteration_bounds = array<i64: 1>, scalar_prefetch = 0 : i64, scratch_operands = 0 : i64, tpu.core_type = #tpu.core_type<tc>, window_params = [{pipeline_mode = #tpu.pipeline_mode<synchronous>, transform_indices = @transform_0, window_bounds = array<i64: 64, 256>}, {transform_indices = @transform_1, window_bounds = array<i64: 256, 8>}, {transform_indices = @transform_2, window_bounds = array<i64: 64, 8>}]} {
    %c0 = arith.constant 0 : index
    %c0_0 = arith.constant 0 : index
    %0 = vector.load %arg2[%c0, %c0_0] : memref<256x8xf32, #tpu.memory_space<vmem>>, vector<256x8xf32>
    %c0_1 = arith.constant 0 : index
    %c0_2 = arith.constant 0 : index
    %1 = vector.load %arg1[%c0_1, %c0_2] : memref<64x256xf32, #tpu.memory_space<vmem>>, vector<64x256xf32>
    %cst = arith.constant dense<0.000000e+00> : vector<64x8xf32>
    %2 = tpu.matmul %1, %0, %cst {dimension_numbers = #tpu.dot_dimension_numbers<[1], [0], [0], [1], [0, 0, 1, 1], [], []>} : vector<64x256xf32>, vector<256x8xf32>, vector<64x8xf32> -> vector<64x8xf32>
    %c0_3 = arith.constant 0 : index
    %c0_4 = arith.constant 0 : index
    %3 = vector.load %arg3[%c0_3, %c0_4] : memref<64x8xf32, #tpu.memory_space<vmem>>, vector<64x8xf32>
    tpu.vector_store %arg3[%c0_3, %c0_4], %2 {strides = array<i32>} : memref<64x8xf32, #tpu.memory_space<vmem>>, vector<64x8xf32>,
    return
  }
  func.func @transform_0(%arg0: i32) -> (i32, i32) {
    %c0_i32 = arith.constant 0 : i32
    %c0_i32_0 = arith.constant 0 : i32
    %c0_i32_1 = arith.constant 0 : i32
    return %c0_i32, %c0_i32_0 : i32, i32
  }
  func.func @transform_1(%arg0: i32) -> (i32, i32) {
    %c0_i32 = arith.constant 0 : i32
    %c0_i32_0 = arith.constant 0 : i32
    return %c0_i32, %arg0 : i32, i32
  }
  func.func @transform_2(%arg0: i32) -> (i32, i32) {
    %c0_i32 = arith.constant 0 : i32
    %c0_i32_0 = arith.constant 0 : i32
    return %c0_i32, %arg0 : i32, i32
  }
}

</mosaic_0001>

<bundles_post_ra>
// kernel: tpu_custom_call.1
= control target key start
LH: loop header
LB: loop body
LE: loop exit
PB: predicated region body
PF: predicated region fallthrough
CT: control target
= control target key end

     0   :  { %vm164_vm0 = vcmask 64512   ;;  %s456_s1 = inlined_call_operand.vmem [shape: f32[256,8], index: 1, kind: input, shape index: {}]   ;;  %s457_s0 = inlined_call_operand.vmem [shape: f32[64,256], index: 0, kind: input, shape index: {}]   ;;  %s458_s2 = inlined_call_operand.vmem [shape: f32[64,8], index: 2, kind: output, shape index: {}]  }
   0x1   :  { %v42_v0 = vld [vmem:[%s456_s1 + $0xf8] sm:$0xff]  ;;  %v41_v2 = vld [vmem:[%s456_s1 + $0xf0] sm:$0xff]  ;;  %v40_v4 = vld [vmem:[%s456_s1 + $0xe8] sm:$0xff] }
   0x2   :  { %v26_v1 = vld [vmem:[%s456_s1 + $0x78] sm:$0xff]  ;;  %177 = vmatprep.subr.mxu0 %v42_v0  ;;  %233 = vmatprep.subr.mxu1 %v42_v0  ;;  %v25_v3 = vld [vmem:[%s456_s1 + $0x70] sm:$0xff]  ;;  %v24_v5 = vld [vmem:[%s456_s1 + $0x68] sm:$0xff] }
   0x3   :  { %178 = vmatpush3.msra.mxu0 %v26_v1  ;;  %249 = vmatpush3.msra.mxu1 %v26_v1  ;;  %v39_v6 = vld [vmem:[%s456_s1 + $0xe0] sm:$0xff]  ;;  %v38_v8 = vld [vmem:[%s456_s1 + $0xd8] sm:$0xff]  ;;  %v37_v10 = vld [vmem:[%s456_s1 + $0xd0] sm:$0xff] }
   0x4   :  { %179 = vmatprep.subr.mxu0 %v41_v2  ;;  %234 = vmatprep.subr.mxu1 %v41_v2  ;;  %v23_v7 = vld [vmem:[%s456_s1 + $0x60] sm:$0xff]  ;;  %v22_v9 = vld [vmem:[%s456_s1 + $0x58] sm:$0xff]  ;;  %v21_v11 = vld [vmem:[%s456_s1 + $0x50] sm:$0xff] }
   0x5   :  { %180 = vmatpush3.msra.mxu0 %v25_v3  ;;  %250 = vmatpush3.msra.mxu1 %v25_v3  ;;  %v36_v12 = vld [vmem:[%s456_s1 + $0xc8] sm:$0xff]  ;;  %v35_v14 = vld [vmem:[%s456_s1 + $0xc0] sm:$0xff]  ;;  %v34_v16 = vld [vmem:[%s456_s1 + $0xb8] sm:$0xff] }
   0x6   :  { %181 = vmatprep.subr.mxu0 %v40_v4  ;;  %235 = vmatprep.subr.mxu1 %v40_v4  ;;  %v20_v13 = vld [vmem:[%s456_s1 + $0x48] sm:$0xff]  ;;  %v19_v15 = vld [vmem:[%s456_s1 + $0x40] sm:$0xff]  ;;  %v18_v17 = vld [vmem:[%s456_s1 + $0x38] sm:$0xff] }
   0x7   :  { %182 = vmatpush3.msra.mxu0 %v24_v5  ;;  %251 = vmatpush3.msra.mxu1 %v24_v5  ;;  %v33_v18 = vld [vmem:[%s456_s1 + $0xb0] sm:$0xff]  ;;  %v32_v20 = vld [vmem:[%s456_s1 + $0xa8] sm:$0xff]  ;;  %v31_v22 = vld [vmem:[%s456_s1 + $0xa0] sm:$0xff] }
   0x8   :  { %183 = vmatprep.subr.mxu0 %v39_v6  ;;  %236 = vmatprep.subr.mxu1 %v39_v6  ;;  %v17_v19 = vld [vmem:[%s456_s1 + $0x30] sm:$0xff]  ;;  %v16_v21 = vld [vmem:[%s456_s1 + $0x28] sm:$0xff]  ;;  %v15_v23 = vld [vmem:[%s456_s1 + $0x20] sm:$0xff] }
   0x9   :  { %184 = vmatpush3.msra.mxu0 %v23_v7  ;;  %252 = vmatpush3.msra.mxu1 %v23_v7  ;;  %v30_v24 = vld [vmem:[%s456_s1 + $0x98] sm:$0xff]  ;;  %v29_v26 = vld [vmem:[%s456_s1 + $0x90] sm:$0xff]  ;;  %v28_v28 = vld [vmem:[%s456_s1 + $0x88] sm:$0xff] }
   0xa   :  { %185 = vmatprep.subr.mxu0 %v38_v8  ;;  %237 = vmatprep.subr.mxu1 %v38_v8  ;;  %v14_v25 = vld [vmem:[%s456_s1 + $0x18] sm:$0xff]  ;;  %v13_v27 = vld [vmem:[%s456_s1 + $0x10] sm:$0xff]  ;;  %v12_v29 = vld [vmem:[%s456_s1 + $0x8] sm:$0xff] }
   0xb   :  { %186 = vmatpush3.msra.mxu0 %v22_v9  ;;  %253 = vmatpush3.msra.mxu1 %v22_v9  ;;  %v27_v30 = vld [vmem:[%s456_s1 + $0x80] sm:$0xff]  ;;  %v44_v32 = vld [vmem:[%s457_s0 + $0x8] sm:$0xff]  ;;  %v46_v36 = vld [vmem:[%s457_s0 + $0x18] sm:$0xff] }
   0xc   :  { %187 = vmatprep.subr.mxu0 %v37_v10  ;;  %238 = vmatprep.subr.mxu1 %v37_v10  ;;  %v11_v31 = vld [vmem:[%s456_s1] sm:$0xff]  ;;  %v52_v33 = vld [vmem:[%s457_s0 + $0x48] sm:$0xff]  ;;  %v54_v37 = vld [vmem:[%s457_s0 + $0x58] sm:$0xff] }
   0xd   :  { %188 = vmatpush3.msra.mxu0 %v21_v11  ;;  %254 = vmatpush3.msra.mxu1 %v21_v11  ;;  %v43_v34 = vld [vmem:[%s457_s0] sm:$0xff]  ;;  %v45_v38 = vld [vmem:[%s457_s0 + $0x10] sm:$0xff]  ;;  %v48_v40 = vld [vmem:[%s457_s0 + $0x28] sm:$0xff] }
   0xe   :  { %189 = vmatprep.subr.mxu0 %v36_v12  ;;  %239 = vmatprep.subr.mxu1 %v36_v12  ;;  %v51_v35 = vld [vmem:[%s457_s0 + $0x40] sm:$0xff]  ;;  %v53_v39 = vld [vmem:[%s457_s0 + $0x50] sm:$0xff]  ;;  %v56_v41 = vld [vmem:[%s457_s0 + $0x68] sm:$0xff] }
   0xf   :  { %190 = vmatpush3.msra.mxu0 %v20_v13  ;;  %255 = vmatpush3.msra.mxu1 %v20_v13  ;;  %v47_v42 = vld [vmem:[%s457_s0 + $0x20] sm:$0xff]  ;;  %v50_v44 = vld [vmem:[%s457_s0 + $0x38] sm:$0xff]  ;;  %v49_v46 = vld [vmem:[%s457_s0 + $0x30] sm:$0xff] }
  0x10   :  { %191 = vmatprep.subr.mxu0 %v35_v14  ;;  %240 = vmatprep.subr.mxu1 %v35_v14  ;;  %v55_v43 = vld [vmem:[%s457_s0 + $0x60] sm:$0xff]  ;;  %v58_v45 = vld [vmem:[%s457_s0 + $0x78] sm:$0xff]  ;;  %v57_v47 = vld [vmem:[%s457_s0 + $0x70] sm:$0xff] }
  0x11   :  { %192 = vmatpush3.msra.mxu0 %v19_v15  ;;  %256 = vmatpush3.msra.mxu1 %v19_v15 }
  0x12   :  { %193 = vmatprep.subr.mxu0 %v34_v16  ;;  %241 = vmatprep.subr.mxu1 %v34_v16 }
  0x13   :  { %194 = vmatpush3.msra.mxu0 %v18_v17  ;;  %257 = vmatpush3.msra.mxu1 %v18_v17 }
  0x14   :  { %195 = vmatprep.subr.mxu0 %v33_v18  ;;  %242 = vmatprep.subr.mxu1 %v33_v18 }
  0x15   :  { %196 = vmatpush3.msra.mxu0 %v17_v19  ;;  %258 = vmatpush3.msra.mxu1 %v17_v19 }
  0x16   :  { %197 = vmatprep.subr.mxu0 %v32_v20  ;;  %243 = vmatprep.subr.mxu1 %v32_v20 }
  0x17   :  { %198 = vmatpush3.msra.mxu0 %v16_v21  ;;  %259 = vmatpush3.msra.mxu1 %v16_v21 }
  0x18   :  { %199 = vmatprep.subr.mxu0 %v31_v22  ;;  %244 = vmatprep.subr.mxu1 %v31_v22 }
  0x19   :  { %200 = vmatpush3.msra.mxu0 %v15_v23  ;;  %260 = vmatpush3.msra.mxu1 %v15_v23 }
  0x1a   :  { %201 = vmatprep.subr.mxu0 %v30_v24  ;;  %245 = vmatprep.subr.mxu1 %v30_v24 }
  0x1b   :  { %202 = vmatpush3.msra.mxu0 %v14_v25  ;;  %261 = vmatpush3.msra.mxu1 %v14_v25 }
  0x1c   :  { %203 = vmatprep.subr.mxu0 %v29_v26  ;;  %246 = vmatprep.subr.mxu1 %v29_v26 }
  0x1d   :  { %204 = vmatpush3.msra.mxu0 %v13_v27  ;;  %262 = vmatpush3.msra.mxu1 %v13_v27 }
  0x1e   :  { %205 = vmatprep.subr.mxu0 %v28_v28  ;;  %247 = vmatprep.subr.mxu1 %v28_v28 }
  0x1f   :  { %206 = vmatpush3.msra.mxu0 %v12_v29  ;;  %263 = vmatpush3.msra.mxu1 %v12_v29 }
  0x20   :  { %207 = vmatprep.subr.mxu0 %v27_v30  ;;  %248 = vmatprep.subr.mxu1 %v27_v30 }
  0x21   :  { %208 = vmatpush3.msra.mxu0 %v11_v31  ;;  %264 = vmatpush3.msra.mxu1 %v11_v31 }
  0x22   :  { %123 = vmatprep.mubr.f32.mxu0 %v44_v32  ;;  %143 = vmatprep.mubr.f32.mxu1 %v52_v33 }
  0x23   :  { %124 = vmatmul.mubr.f32.vlgmr.msra.gmra.mxu0 %v43_v34  ;;  %144 = vmatmul.mubr.f32.vlgmr.msra.gmra.mxu1 %v51_v35 }
  0x24   :  { %128 = vmatprep.mubr.f32.mxu0 %v46_v36  ;;  %148 = vmatprep.mubr.f32.mxu1 %v54_v37 }
  0x27   :  { %129 = vmatmul.mubr.f32.gmra.mxu0 %v45_v38  ;;  %149 = vmatmul.mubr.f32.gmra.mxu1 %v53_v39 }
  0x28   :  { %133 = vmatprep.mubr.f32.mxu0 %v48_v40  ;;  %153 = vmatprep.mubr.f32.mxu1 %v56_v41 }
  0x2b   :  { %134 = vmatmul.mubr.f32.gmra.mxu0 %v47_v42  ;;  %154 = vmatmul.mubr.f32.gmra.mxu1 %v55_v43 }
  0x2c   :  { %138 = vmatprep.mubr.f32.mxu0 %v50_v44  ;;  %158 = vmatprep.mubr.f32.mxu1 %v58_v45 }
  0x2f   :  { %139 = vmatmul.mubr.f32.gmra.mxu0 %v49_v46  ;;  %159 = vmatmul.mubr.f32.gmra.mxu1 %v57_v47 }
  0xe3   :  { %v209_v48 = vpop.f32.mrf.mxu0  ;;  %v221_v49 = vpop.f32.mrf.mxu1 }
  0xe5   :  { %v210_v50 = vpop.f32.mrf.mxu0  ;;  %v222_v51 = vpop.f32.mrf.mxu1 }
  0xe6   :  { %v211_v52 = vadd.f32 %v210_v50, %v209_v48  ;;  %v223_v53 = vadd.f32 %v222_v51, %v221_v49 }
  0xe7   :  { %v212_v54 = vpop.f32.mrf.mxu0  ;;  %v224_v55 = vpop.f32.mrf.mxu1 }
  0xe8   :  { %165 = vst.msk [vmem:[%s458_s2] sm:$0xff] %vm164_vm0, %v211_v52  ;;  %169 = vst.msk [vmem:[%s458_s2 + $0x20] sm:$0xff] %vm164_vm0, %v223_v53 }
  0xe9   :  { %v213_v56 = vpop.f32.mrf.mxu0  ;;  %v225_v57 = vpop.f32.mrf.mxu1 }
  0xea   :  { %v214_v58 = vadd.f32 %v213_v56, %v212_v54  ;;  %v226_v59 = vadd.f32 %v225_v57, %v224_v55 }
  0xeb   :  { %v215_v60 = vpop.f32.mrf.mxu0  ;;  %v227_v61 = vpop.f32.mrf.mxu1 }
  0xec   :  { %166 = vst.msk [vmem:[%s458_s2 + $0x8] sm:$0xff] %vm164_vm0, %v214_v58  ;;  %170 = vst.msk [vmem:[%s458_s2 + $0x28] sm:$0xff] %vm164_vm0, %v226_v59 }
  0xed   :  { %v216_v62 = vpop.f32.mrf.mxu0  ;;  %v228_v63 = vpop.f32.mrf.mxu1 }
  0xee   :  { %v217_v0 = vadd.f32 %v216_v62, %v215_v60  ;;  %v229_v1 = vadd.f32 %v228_v63, %v227_v61 }
  0xef   :  { %v218_v2 = vpop.f32.mrf.mxu0  ;;  %v230_v3 = vpop.f32.mrf.mxu1 }
  0xf0   :  { %167 = vst.msk [vmem:[%s458_s2 + $0x10] sm:$0xff] %vm164_vm0, %v217_v0  ;;  %171 = vst.msk [vmem:[%s458_s2 + $0x30] sm:$0xff] %vm164_vm0, %v229_v1 }
  0xf1   :  { %v219_v4 = vpop.f32.mrf.mxu0  ;;  %v231_v5 = vpop.f32.mrf.mxu1 }
  0xf2   :  { %v220_v6 = vadd.f32 %v219_v4, %v218_v2  ;;  %v232_v7 = vadd.f32 %v231_v5, %v230_v3 }
  0xf4   :  { %168 = vst.msk [vmem:[%s458_s2 + $0x18] sm:$0xff] %vm164_vm0, %v220_v6  ;;  %172 = vst.msk [vmem:[%s458_s2 + $0x38] sm:$0xff] %vm164_vm0, %v232_v7 }

</bundles_post_ra>
